<compile_context>
chip_gen: v7x
topology: tpu7x:2x2x1
jax: 0.10.0
libtpu: 0.0.40
codegen_flags: <defaults>
</compile_context>

<pallas_src>
import functools

import jax
import jax.numpy as jnp
from jax.experimental import pallas as pl
from jax.experimental.pallas import tpu as pltpu


def _allgather_copy_kernel(local_hbm, out_hbm, sems, *, num_chunks, chunk_rows):
    """Coalesced HBM->HBM gather.

    Both refs are [world_size, batch, dim] raw HBM refs.  The copy is issued as
    `num_chunks` contiguous leading-dim slabs (num_chunks == 1 for typical
    pooled-embedding sizes), all started before any wait so the DMA engines
    overlap them.  No VMEM staging, no vector slots used.
    """
    copies = []
    for c in range(num_chunks):
        cp = pltpu.make_async_copy(
            local_hbm.at[pl.ds(c * chunk_rows, chunk_rows)],
            out_hbm.at[pl.ds(c * chunk_rows, chunk_rows)],
            sems.at[c],
        )
        cp.start()
        copies.append(cp)
    for cp in copies:
        cp.wait()


def _pick_num_chunks(world_size: int, payload_bytes: int) -> int:
    """One DMA for typical payloads; 2-8 multi-MiB DMAs for very large ones."""
    if payload_bytes < (64 << 20):  # < 64 MiB: a single DMA is already roofline
        return 1
    # Largest divisor of world_size that is <= 8 (keeps slabs contiguous and
    # descriptor overhead negligible while giving the DMA engines a few
    # in-flight copies).
    for cand in (8, 7, 6, 5, 4, 3, 2):
        if world_size % cand == 0:
            return cand
    return 1


def pooled_embeddings_all_gather(local_embs: jax.Array) -> jax.Array:
    """All-gather of pooled embeddings.

    Args:
      local_embs: [world_size, batch_size, dimension] rank-stacked local
        pooled-embedding tensors.

    Returns:
      [world_size * batch_size, dimension] flattened gathered tensor
      (same as `output.wait()` in the PyTorch module).
    """
    world_size, batch, dim = local_embs.shape
    itemsize = jnp.dtype(local_embs.dtype).itemsize
    payload_bytes = world_size * batch * dim * itemsize

    num_chunks = _pick_num_chunks(world_size, payload_bytes)
    chunk_rows = world_size // num_chunks

    kernel = functools.partial(
        _allgather_copy_kernel, num_chunks=num_chunks, chunk_rows=chunk_rows
    )

    gathered = pl.pallas_call(
        kernel,
        # Keep the rank-stacked shape for the copy; flatten for free below.
        out_shape=jax.ShapeDtypeStruct((world_size, batch, dim), local_embs.dtype),
        # Raw HBM refs: no auto HBM<->VMEM pipeline, the kernel DMAs directly.
        in_specs=[pl.BlockSpec(memory_space=pl.ANY)],
        out_specs=pl.BlockSpec(memory_space=pl.ANY),
        scratch_shapes=[pltpu.SemaphoreType.DMA((num_chunks,))],
        # Pure copy: read + write of the full payload, zero flops.
        cost_estimate=pl.CostEstimate(
            flops=0, transcendentals=0, bytes_accessed=2 * payload_bytes
        ),
    )(local_embs)

    # [world_size, batch, dim] -> [world_size*batch, dim] is a row-major
    # leading-dim collapse: free (no data movement).
    return gathered.reshape(world_size * batch, dim)


if __name__ == "__main__":
    # Small, deterministic example: world_size=4 ranks, batch=8, dim=128.
    world_size, batch, dim = 4, 8, 128
    key = jax.random.PRNGKey(0)
    local_embs = jax.random.normal(key, (world_size, batch, dim), dtype=jnp.float32)

    out = pooled_embeddings_all_gather(local_embs)
    out = jax.block_until_ready(out)

    # Reference: all-gather == flat concat of all ranks' local tensors.
    ref = local_embs.reshape(world_size * batch, dim)
    assert out.shape == (world_size * batch, dim)
    assert out.dtype == local_embs.dtype
    assert jnp.array_equal(out, ref), "all-gather output mismatch"

    print("KERNEL_OK")
</pallas_src>

<mosaic_0001>
module attributes {stable_mosaic.version = 11 : i64} {
  func.func @_allgather_copy_kernel(%arg0: memref<4x8x128xf32, #tpu.memory_space<any>>, %arg1: memref<4x8x128xf32, #tpu.memory_space<any>>, %arg2: memref<1x!tpu.dma_semaphore, #tpu.memory_space<semaphore_mem>>) attributes {dimension_semantics = [], scalar_prefetch = 0 : i64, scratch_operands = 1 : i64, tpu.core_type = #tpu.core_type<tc>} {
    %c0_i32 = arith.constant 0 : i32
    %c0_i32_0 = arith.constant 0 : i32
    %c0_i32_1 = arith.constant 0 : i32
    %c0_i32_2 = arith.constant 0 : i32
    %0 = tpu.memref_slice %arg0[%c0_i32_0, %c0_i32_1, %c0_i32_2] : memref<4x8x128xf32, #tpu.memory_space<any>> -> memref<4x8x128xf32, #tpu.memory_space<any>>
    %c0_i32_3 = arith.constant 0 : i32
    %c0_i32_4 = arith.constant 0 : i32
    %c0_i32_5 = arith.constant 0 : i32
    %1 = tpu.memref_slice %arg1[%c0_i32_3, %c0_i32_4, %c0_i32_5] : memref<4x8x128xf32, #tpu.memory_space<any>> -> memref<4x8x128xf32, #tpu.memory_space<any>>
    %2 = tpu.memref_slice %arg2[%c0_i32] : memref<1x!tpu.dma_semaphore, #tpu.memory_space<semaphore_mem>> -> memref<1x!tpu.dma_semaphore, #tpu.memory_space<semaphore_mem>>
    %3 = tpu.memref_squeeze %2 : memref<1x!tpu.dma_semaphore, #tpu.memory_space<semaphore_mem>> -> memref<!tpu.dma_semaphore, #tpu.memory_space<semaphore_mem>>
    tpu.enqueue_dma source(%0 : memref<4x8x128xf32, #tpu.memory_space<any>>) target(%1 : memref<4x8x128xf32, #tpu.memory_space<any>>) target_semaphore(%3 : memref<!tpu.dma_semaphore, #tpu.memory_space<semaphore_mem>>)
    %c0_i32_6 = arith.constant 0 : i32
    %c0_i32_7 = arith.constant 0 : i32
    %c0_i32_8 = arith.constant 0 : i32
    %c0_i32_9 = arith.constant 0 : i32
    %4 = tpu.memref_slice %arg0[%c0_i32_7, %c0_i32_8, %c0_i32_9] : memref<4x8x128xf32, #tpu.memory_space<any>> -> memref<4x8x128xf32, #tpu.memory_space<any>>
    %c0_i32_10 = arith.constant 0 : i32
    %c0_i32_11 = arith.constant 0 : i32
    %c0_i32_12 = arith.constant 0 : i32
    %5 = tpu.memref_slice %arg1[%c0_i32_10, %c0_i32_11, %c0_i32_12] : memref<4x8x128xf32, #tpu.memory_space<any>> -> memref<4x8x128xf32, #tpu.memory_space<any>>
    %6 = tpu.memref_slice %arg2[%c0_i32_6] : memref<1x!tpu.dma_semaphore, #tpu.memory_space<semaphore_mem>> -> memref<1x!tpu.dma_semaphore, #tpu.memory_space<semaphore_mem>>
    %7 = tpu.memref_squeeze %6 : memref<1x!tpu.dma_semaphore, #tpu.memory_space<semaphore_mem>> -> memref<!tpu.dma_semaphore, #tpu.memory_space<semaphore_mem>>
    tpu.wait_dma2 semaphore(%7 : memref<!tpu.dma_semaphore, #tpu.memory_space<semaphore_mem>>) src(%4 : memref<4x8x128xf32, #tpu.memory_space<any>>) dst(%5 : memref<4x8x128xf32, #tpu.memory_space<any>>)
    return
  }
}

</mosaic_0001>

<bundles_post_ra>
// kernel: tpu_custom_call.1
= control target key start
LH: loop header
LB: loop body
LE: loop exit
PB: predicated region body
PF: predicated region fallthrough
CT: control target
= control target key end

     0   :  { %s35_s6 = smov [#allocation2]   ;;  %s36_s7 = smov [#allocation3]   ;;  %s54_s0 = inlined_call_operand.hbm [shape: f32[4,8,128], index: 0, kind: input, shape index: {}]   ;;  %s55_s1 = inlined_call_operand.hbm [shape: f32[4,8,128], index: 1, kind: output, shape index: {}]  }
   0x1   :  { %s37_s8 = smov 0  }
   0x2   :  { %18 = dma.general %s54_s0, 512, %s55_s1, %s35_s6, %s36_s7, [#allocation4], %s37_s8, 0  }
   0x3   :  { %33 = dma.done.wait [#allocation2], 512 }
   0x4   :  { %34 = vsyncadd [#allocation2], 4294966784 }
   0x5   :  { %23 = vsyncmov [#allocation2] }
   0x8   :  { %s24_s13 = vpop.sfrf %23 }
   0x9   :  { %p29_p0 = scmp.ne.s32.totalorder %s24_s13, 0 }
   0xb   :  { %28 = shalt.err (%p29_p0)  }

</bundles_post_ra>
